<compile_context>
chip_gen: v6e
topology: v6e:2x2x1
jax: 0.10.0
libtpu: 0.0.40
codegen_flags: <defaults>
</compile_context>

<pallas_src>
import jax
import jax.numpy as jnp
from jax.experimental import pallas as pl
from jax.experimental.pallas import tpu as pltpu


ENSEMBLE_SIZE = 3


def _fused_ensemble_kernel(x_ref, w1_ref, b1_ref, w2_ref, b2_ref, w3_ref, b3_ref, o_ref):
    """Single invocation: all E critics fused along the lane (feature) axis.

    Block-diagonal w2 / w3 keep the E critics mathematically independent
    while letting one matmul chain evaluate the whole ensemble.
    """
    x = x_ref[...]                                                        # (B, in_dim)
    h1 = jnp.dot(x, w1_ref[...], preferred_element_type=jnp.float32) + b1_ref[...]
    h1 = jnp.maximum(h1, 0.0)                                             # (B, E*H)
    h2 = jnp.dot(h1, w2_ref[...], preferred_element_type=jnp.float32) + b2_ref[...]
    h2 = jnp.maximum(h2, 0.0)                                             # (B, E*H)
    q = jnp.dot(h2, w3_ref[...], preferred_element_type=jnp.float32) + b3_ref[...]
    o_ref[...] = q.astype(o_ref.dtype)                                    # (B, E)


def _pack_ensemble_params(params):
    """Pack per-critic weights into lane-fused / block-diagonal matrices."""
    w1, b1 = params["w1"], params["b1"]      # (E, in_dim, H), (E, 1, H)
    w2, b2 = params["w2"], params["b2"]      # (E, H, H),      (E, 1, H)
    w3, b3 = params["w3"], params["b3"]      # (E, H, 1),      (E, 1, 1)
    E, in_dim, H = w1.shape
    EH = E * H
    dt = w1.dtype

    # Layer 1: concat per-member output columns -> (in_dim, E*H).
    w1p = jnp.transpose(w1, (1, 0, 2)).reshape(in_dim, EH)
    b1p = b1.reshape(1, EH)

    # Layer 2: block-diagonal (E*H, E*H).
    w2p = jnp.zeros((EH, EH), dt)
    for e in range(E):
        w2p = w2p.at[e * H:(e + 1) * H, e * H:(e + 1) * H].set(w2[e])
    b2p = b2.reshape(1, EH)

    # Layer 3: block-diagonal (E*H, E); output column e reads only member e's h2.
    w3p = jnp.zeros((EH, E), dt)
    for e in range(E):
        w3p = w3p.at[e * H:(e + 1) * H, e].set(w3[e, :, 0])
    b3p = b3.reshape(1, E)

    return w1p, b1p, w2p, b2p, w3p, b3p


def ensembled_critic_forward_stacked(x, params):
    """All ensemble members in ONE pallas_call (no grid). Returns (B, E) f32."""
    w1p, b1p, w2p, b2p, w3p, b3p = _pack_ensemble_params(params)
    B = x.shape[0]
    E = params["w1"].shape[0]

    vmem_specs = [pl.BlockSpec(memory_space=pltpu.MemorySpace.VMEM) for _ in range(7)]

    return pl.pallas_call(
        _fused_ensemble_kernel,
        out_shape=jax.ShapeDtypeStruct((B, E), jnp.float32),
        in_specs=vmem_specs,
        out_specs=pl.BlockSpec(memory_space=pltpu.MemorySpace.VMEM),
    )(x, w1p, b1p, w2p, b2p, w3p, b3p)


def ensembled_critic_forward(x, params):
    """Mirrors PyTorch EnsembledCritic.forward: returns a list of E (B, 1) arrays.

    The kernel itself returns the stacked (B, E) array; the list is produced
    by cheap slices purely for API parity with the reference module.
    """
    q = ensembled_critic_forward_stacked(x, params)
    E = params["w1"].shape[0]
    return [q[:, e:e + 1] for e in range(E)]


def init_ensemble_params(key, ensemble_size, in_dim, hidden):
    """Deterministic per-critic init (deepcopy + reset_parameters analogue:
    every ensemble member gets its own independent weights)."""
    keys = jax.random.split(key, 6)

    def uniform(k, shape, fan_in):
        bound = 1.0 / jnp.sqrt(jnp.float32(fan_in))
        return jax.random.uniform(k, shape, jnp.float32, -bound, bound)

    return {
        "w1": uniform(keys[0], (ensemble_size, in_dim, hidden), in_dim),
        "b1": uniform(keys[1], (ensemble_size, 1, hidden), in_dim),
        "w2": uniform(keys[2], (ensemble_size, hidden, hidden), hidden),
        "b2": uniform(keys[3], (ensemble_size, 1, hidden), hidden),
        "w3": uniform(keys[4], (ensemble_size, hidden, 1), hidden),
        "b3": uniform(keys[5], (ensemble_size, 1, 1), hidden),
    }


def _reference_forward(x, params):
    """Pure-JAX reference for the same ensemble of MLP critics."""
    outs = []
    for e in range(params["w1"].shape[0]):
        h1 = jnp.maximum(x @ params["w1"][e] + params["b1"][e], 0.0)
        h2 = jnp.maximum(h1 @ params["w2"][e] + params["b2"][e], 0.0)
        outs.append(h2 @ params["w3"][e] + params["b3"][e])
    return outs


if __name__ == "__main__":
    key = jax.random.PRNGKey(0)
    k_obs, k_goal, k_act, k_par = jax.random.split(key, 4)

    B = 8            # batch
    obs_dim = 16
    goal_dim = 16
    act_dim = 8
    hidden = 32
    in_dim = obs_dim + goal_dim + act_dim  # 40

    obs = jax.random.normal(k_obs, (B, obs_dim), jnp.float32)
    goal = jax.random.normal(k_goal, (B, goal_dim), jnp.float32)
    action = jax.random.normal(k_act, (B, act_dim), jnp.float32)
    x = jnp.concatenate([obs, goal, action], axis=-1)   # (B, in_dim)

    params = init_ensemble_params(k_par, ENSEMBLE_SIZE, in_dim, hidden)

    # Single fused kernel call; list interface for PyTorch parity.
    q_list = ensembled_critic_forward(x, params)
    q_list = [jax.block_until_ready(q) for q in q_list]

    # Correctness check against pure-JAX reference.
    ref_list = _reference_forward(x, params)
    for q, r in zip(q_list, ref_list):
        assert q.shape == (B, 1)
        assert jnp.allclose(q, r, atol=1e-5, rtol=1e-5)

    print("KERNEL_OK")
</pallas_src>

<mosaic_0001>
module attributes {stable_mosaic.version = 11 : i64} {
  func.func @_fused_ensemble_kernel(%arg0: memref<8x40xf32, #tpu.memory_space<vmem>>, %arg1: memref<40x96xf32, #tpu.memory_space<vmem>>, %arg2: memref<1x96xf32, #tpu.memory_space<vmem>>, %arg3: memref<96x96xf32, #tpu.memory_space<vmem>>, %arg4: memref<1x96xf32, #tpu.memory_space<vmem>>, %arg5: memref<96x3xf32, #tpu.memory_space<vmem>>, %arg6: memref<1x3xf32, #tpu.memory_space<vmem>>, %arg7: memref<8x3xf32, #tpu.memory_space<vmem>>) attributes {dimension_semantics = [], scalar_prefetch = 0 : i64, scratch_operands = 0 : i64, tpu.core_type = #tpu.core_type<tc>} {
    %c0 = arith.constant 0 : index
    %c0_0 = arith.constant 0 : index
    %0 = vector.load %arg0[%c0, %c0_0] : memref<8x40xf32, #tpu.memory_space<vmem>>, vector<8x40xf32>
    %c0_1 = arith.constant 0 : index
    %c0_2 = arith.constant 0 : index
    %1 = vector.load %arg1[%c0_1, %c0_2] : memref<40x96xf32, #tpu.memory_space<vmem>>, vector<40x96xf32>
    %cst = arith.constant dense<0.000000e+00> : vector<8x96xf32>
    %2 = tpu.matmul %0, %1, %cst {dimension_numbers = #tpu.dot_dimension_numbers<[1], [0], [0], [1], [0, 0, 1, 1], [], []>} : vector<8x40xf32>, vector<40x96xf32>, vector<8x96xf32> -> vector<8x96xf32>
    %c0_3 = arith.constant 0 : index
    %c0_4 = arith.constant 0 : index
    %3 = vector.load %arg2[%c0_3, %c0_4] : memref<1x96xf32, #tpu.memory_space<vmem>>, vector<1x96xf32>
    %4 = vector.broadcast %3 : vector<1x96xf32> to vector<8x96xf32>
    %5 = arith.addf %2, %4 : vector<8x96xf32>
    %cst_5 = arith.constant 0.000000e+00 : f32
    %6 = vector.broadcast %cst_5 : f32 to vector<8x96xf32>
    %7 = arith.maximumf %5, %6 : vector<8x96xf32>
    %c0_6 = arith.constant 0 : index
    %c0_7 = arith.constant 0 : index
    %8 = vector.load %arg3[%c0_6, %c0_7] : memref<96x96xf32, #tpu.memory_space<vmem>>, vector<96x96xf32>
    %cst_8 = arith.constant dense<0.000000e+00> : vector<8x96xf32>
    %9 = tpu.matmul %7, %8, %cst_8 {dimension_numbers = #tpu.dot_dimension_numbers<[1], [0], [0], [1], [0, 0, 1, 1], [], []>} : vector<8x96xf32>, vector<96x96xf32>, vector<8x96xf32> -> vector<8x96xf32>
    %c0_9 = arith.constant 0 : index
    %c0_10 = arith.constant 0 : index
    %10 = vector.load %arg4[%c0_9, %c0_10] : memref<1x96xf32, #tpu.memory_space<vmem>>, vector<1x96xf32>
    %11 = vector.broadcast %10 : vector<1x96xf32> to vector<8x96xf32>
    %12 = arith.addf %9, %11 : vector<8x96xf32>
    %cst_11 = arith.constant 0.000000e+00 : f32
    %13 = vector.broadcast %cst_11 : f32 to vector<8x96xf32>
    %14 = arith.maximumf %12, %13 : vector<8x96xf32>
    %c0_12 = arith.constant 0 : index
    %c0_13 = arith.constant 0 : index
    %15 = vector.load %arg5[%c0_12, %c0_13] : memref<96x3xf32, #tpu.memory_space<vmem>>, vector<96x3xf32>
    %cst_14 = arith.constant dense<0.000000e+00> : vector<8x3xf32>
    %16 = tpu.matmul %14, %15, %cst_14 {dimension_numbers = #tpu.dot_dimension_numbers<[1], [0], [0], [1], [0, 0, 1, 1], [], []>} : vector<8x96xf32>, vector<96x3xf32>, vector<8x3xf32> -> vector<8x3xf32>
    %c0_15 = arith.constant 0 : index
    %c0_16 = arith.constant 0 : index
    %17 = vector.load %arg6[%c0_15, %c0_16] : memref<1x3xf32, #tpu.memory_space<vmem>>, vector<1x3xf32>
    %18 = vector.broadcast %17 : vector<1x3xf32> to vector<8x3xf32>
    %19 = arith.addf %16, %18 : vector<8x3xf32>
    %c0_17 = arith.constant 0 : index
    %c0_18 = arith.constant 0 : index
    %20 = vector.load %arg7[%c0_17, %c0_18] : memref<8x3xf32, #tpu.memory_space<vmem>>, vector<8x3xf32>
    tpu.vector_store %arg7[%c0_17, %c0_18], %19 {strides = array<i32>} : memref<8x3xf32, #tpu.memory_space<vmem>>, vector<8x3xf32>,
    return
  }
}

</mosaic_0001>

<bundles_post_ra>
// kernel: tpu_custom_call.1
= control target key start
LH: loop header
LB: loop body
LE: loop exit
PB: predicated region body
PF: predicated region fallthrough
CT: control target
= control target key end

     0   :  { %12 = vsyncpa [#allocation3], 0  ;;  %s662_s0 = inlined_call_operand.vmem [shape: f32[8,40], index: 0, kind: input, shape index: {}]   ;;  %s663_s1 = inlined_call_operand.hbm [shape: f32[40,96], index: 1, kind: input, shape index: {}]   ;;  %s664_s2 = inlined_call_operand.vmem [shape: f32[1,96], index: 2, kind: input, shape index: {}]   ;;  %s665_s3 = inlined_call_operand.vmem [shape: f32[96,96], index: 3, kind: input, shape index: {}]   ;;  %s666_s4 = inlined_call_operand.hbm [shape: f32[1,96], index: 4, kind: input, shape index: {}]   ;;  %s667_s5 = inlined_call_operand.vmem [shape: f32[96,3], index: 5, kind: input, shape index: {}]   ;;  %s668_s6 = inlined_call_operand.vmem [shape: f32[1,3], index: 6, kind: input, shape index: {}]   ;;  %s669_s7 = inlined_call_operand.vmem [shape: f32[8,3], index: 7, kind: output, shape index: {}]  }
   0x1   :  { %13 = vsyncpa [#allocation5], 0  ;;  %s489_s24 = smov [#allocation2]  }
   0x2   :  { %s21_s25 = sshll.u32 %s489_s24, 4  ;;  %s22_s25 = int_to_ptr.vmem [resolvable:$true] %s21_s25 }
   0x3   :  { %s453_s26 = scalar_lea.vmem %s22_s25, 640  ;;  %p458_p1 = scmp.lt.s32.totalorder %s22_s25, %s22_s25 }
   0x4   :  { %p454_p0 = scmp.ne.s32.totalorder %s22_s25, %s453_s26  ;;  %p459_p2 = scmp.lt.s32.totalorder %s453_s26, %s453_s26 }
   0x6   :  { %p460_p3 = por %p459_p2, %p458_p1 }
   0x8   :  { %p461_p4 = pnand %p460_p3, %p454_p0 }
   0xa   :  { %464 = shalt.err (!%p461_p4)
}
   0xb   :  { %s490_s27 = smov 128   ;;  %s491_s28 = smov 8  }
   0xc   :  { %27 = dma.hbm_to_vmem [thread:$0]  %s663_s1, 640, %s22_s25, [#allocation3], %s490_s27, %s490_s27, %s491_s28  }
   0xd   :  { %s492_s8 = smov [#allocation4]  }
   0xe   :  { %s38_s9 = sshll.u32 %s492_s8, 4  ;;  %s39_s9 = int_to_ptr.vmem [resolvable:$true] %s38_s9 }
   0xf   :  { %s473_s10 = scalar_lea.vmem %s39_s9, 16  ;;  %s477_s11 = scalar_lea.vmem %s39_s9, 32 }
  0x10   :  { %p474_p5 = scmp.ne.s32.totalorder %s39_s9, %s473_s10  ;;  %p478_p6 = scmp.lt.s32.totalorder %s39_s9, %s39_s9 }
  0x11   :  { %p479_p7 = scmp.lt.s32.totalorder %s477_s11, %s473_s10 }
  0x13   :  { %p480_p8 = por %p479_p7, %p478_p6 }
  0x15   :  { %p481_p9 = pnand %p480_p8, %p474_p5 }
  0x17   :  { %484 = shalt.err (!%p481_p9)
}
  0x18   :  { %41 = dma.hbm_to_vmem [thread:$0]  %s666_s4, 16, %s39_s9, [#allocation5]  }
  0x19   :  { %485 = dma.done.wait [#allocation3], 640  }
  0x1a   :  { %486 = vsyncadd [#allocation3], 4294966656 }
  0x1b   :  { %487 = dma.done.wait [#allocation5], 16  }
  0x1c   :  { %488 = vsyncadd [#allocation5], 4294967280  ;;  %v493_v0 = vmov 0.0   ;;  %vm494_vm0 = vmmov 0   ;;  %v57_v1 = vld [vmem:[#allocation2 + $0x20] sm:$0xff]  ;;  %v56_v2 = vld [vmem:[#allocation2 + $0x18] sm:$0xff] }
  0x1d   :  { %372 = vmatprep.subr.mxu0 %v493_v0  ;;  %382 = vmatprep.mubr.msk.f32.mxu0 %vm494_vm0, %v493_v0  ;;  %v55_v3 = vld [vmem:[#allocation2 + $0x10] sm:$0xff]  ;;  %v151_v4 = vld [vmem:[%s665_s3 + $0x58] sm:$0xff]  ;;  %v54_v6 = vld [vmem:[#allocation2 + $0x8] sm:$0xff]  ;;  %vm65_vm1 = vcmask 326656   ;;  %vm159_vm2 = vcmask 785408   ;;  %vm326_vm3 = vcmask 23552  }
  0x1e   :  { %385 = vmatprep.subr.mxu1 %v493_v0  ;;  %409 = vmatprep.mubr.msk.f32.mxu1 %vm494_vm0, %v493_v0  ;;  %v150_v5 = vld [vmem:[%s665_s3 + $0x50] sm:$0xff]  ;;  %v149_v7 = vld [vmem:[%s665_s3 + $0x48] sm:$0xff]  ;;  %v53_v8 = vld [vmem:[#allocation2] sm:$0xff] }
  0x1f   :  { %373 = vmatpush3.msra.mxu0 %v57_v1  ;;  %386 = vmatpush3.msra.mxu1 %v151_v4  ;;  %v148_v9 = vld [vmem:[%s665_s3 + $0x40] sm:$0xff]  ;;  %v147_v11 = vld [vmem:[%s665_s3 + $0x38] sm:$0xff]  ;;  %v146_v12 = vld [vmem:[%s665_s3 + $0x30] sm:$0xff] }
  0x20   :  { %374 = vmatprep.subr.mxu0 %v493_v0  ;;  %387 = vmatprep.subr.mxu1 %v493_v0  ;;  %v52_v10 = vld [vmem:[%s662_s0] sm:$0xff]  ;;  %v145_v13 = vld [vmem:[%s665_s3 + $0x28] sm:$0xff]  ;;  %v143_v15 = vld [vmem:[%s665_s3 + $0x18] sm:$0xff] }
  0x21   :  { %375 = vmatpush3.msra.mxu0 %v56_v2  ;;  %388 = vmatpush3.msra.mxu1 %v150_v5  ;;  %v144_v14 = vld [vmem:[%s665_s3 + $0x20] sm:$0xff]  ;;  %v142_v16 = vld [vmem:[%s665_s3 + $0x10] sm:$0xff]  ;;  %v141_v17 = vld [vmem:[%s665_s3 + $0x8] sm:$0xff] }
  0x22   :  { %376 = vmatprep.subr.mxu0 %v493_v0  ;;  %389 = vmatprep.subr.mxu1 %v493_v0  ;;  %v140_v18 = vld [vmem:[%s665_s3] sm:$0xff]  ;;  %v245_v19 = vld [vmem:[%s667_s5 + $0x58] sm:$0xff]  ;;  %v244_v20 = vld [vmem:[%s667_s5 + $0x50] sm:$0xff] }
  0x23   :  { %377 = vmatpush3.msra.mxu0 %v55_v3  ;;  %390 = vmatpush3.msra.mxu1 %v149_v7  ;;  %v243_v21 = vld [vmem:[%s667_s5 + $0x48] sm:$0xff]  ;;  %v242_v22 = vld [vmem:[%s667_s5 + $0x40] sm:$0xff]  ;;  %v241_v23 = vld [vmem:[%s667_s5 + $0x38] sm:$0xff] }
  0x24   :  { %378 = vmatprep.subr.mxu0 %v493_v0  ;;  %391 = vmatprep.subr.mxu1 %v493_v0  ;;  %v240_v24 = vld [vmem:[%s667_s5 + $0x30] sm:$0xff]  ;;  %v239_v25 = vld [vmem:[%s667_s5 + $0x28] sm:$0xff]  ;;  %v238_v26 = vld [vmem:[%s667_s5 + $0x20] sm:$0xff] }
  0x25   :  { %379 = vmatpush3.msra.mxu0 %v54_v6  ;;  %392 = vmatpush3.msra.mxu1 %v148_v9  ;;  %v237_v27 = vld [vmem:[%s667_s5 + $0x18] sm:$0xff]  ;;  %v334_v28 = vld [vmem:[%s664_s2] ss:$0 sm:$0xff]  ;;  %v236_v33 = vld [vmem:[%s667_s5 + $0x10] sm:$0xff] }
  0x26   :  { %380 = vmatprep.subr.mxu0 %v493_v0  ;;  %393 = vmatprep.subr.mxu1 %v493_v0  ;;  %v235_v34 = vld [vmem:[%s667_s5 + $0x8] sm:$0xff]  ;;  %v234_v35 = vld [vmem:[%s667_s5] sm:$0xff] }
  0x27   :  { %381 = vmatpush3.msra.mxu0 %v53_v8  ;;  %394 = vmatpush3.msra.mxu1 %v147_v11  ;;  %v336_v36 = vld [vmem:[#allocation4] ss:$0 sm:$0xff]  ;;  %v338_v41 = vld [vmem:[%s668_s6] ss:$0 sm:$0xff] }
  0x28   :  { %383 = vmatmul.mubr.msk.f32.vlgmr.msra.gmra.mxu0 %vm65_vm1, %v52_v10  ;;  %412 = vmatprep.subr.mxu0 %v493_v0 }
  0x29   :  { %395 = vmatprep.subr.mxu1 %v493_v0  ;;  %436 = vmatprep.mubr.msk.f32.mxu0 %vm494_vm0, %v493_v0 }
  0x2a   :  { %396 = vmatpush3.msra.mxu1 %v146_v12  ;;  %413 = vmatpush3.msra.mxu0 %v245_v19 }
  0x2b   :  { %397 = vmatprep.subr.mxu1 %v493_v0  ;;  %414 = vmatprep.subr.mxu0 %v493_v0 }
  0x2c   :  { %398 = vmatpush3.msra.mxu1 %v145_v13  ;;  %415 = vmatpush3.msra.mxu0 %v244_v20 }
  0x2d   :  { %399 = vmatprep.subr.mxu1 %v493_v0  ;;  %416 = vmatprep.subr.mxu0 %v493_v0 }
  0x2e   :  { %400 = vmatpush3.msra.mxu1 %v144_v14  ;;  %417 = vmatpush3.msra.mxu0 %v243_v21 }
  0x2f   :  { %401 = vmatprep.subr.mxu1 %v493_v0  ;;  %418 = vmatprep.subr.mxu0 %v493_v0 }
  0x30   :  { %402 = vmatpush3.msra.mxu1 %v143_v15  ;;  %419 = vmatpush3.msra.mxu0 %v242_v22 }
  0x31   :  { %403 = vmatprep.subr.mxu1 %v493_v0  ;;  %420 = vmatprep.subr.mxu0 %v493_v0 }
  0x32   :  { %404 = vmatpush3.msra.mxu1 %v142_v16  ;;  %421 = vmatpush3.msra.mxu0 %v241_v23 }
  0x33   :  { %405 = vmatprep.subr.mxu1 %v493_v0  ;;  %422 = vmatprep.subr.mxu0 %v493_v0 }
  0x34   :  { %406 = vmatpush3.msra.mxu1 %v141_v17  ;;  %423 = vmatpush3.msra.mxu0 %v240_v24 }
  0x35   :  { %407 = vmatprep.subr.mxu1 %v493_v0  ;;  %424 = vmatprep.subr.mxu0 %v493_v0 }
  0x36   :  { %408 = vmatpush3.msra.mxu1 %v140_v18  ;;  %425 = vmatpush3.msra.mxu0 %v239_v25 }
  0x37   :  { %426 = vmatprep.subr.mxu0 %v493_v0 }
  0x38   :  { %427 = vmatpush3.msra.mxu0 %v238_v26 }
  0x39   :  { %428 = vmatprep.subr.mxu0 %v493_v0 }
  0x3a   :  { %429 = vmatpush3.msra.mxu0 %v237_v27 }
  0x3b   :  { %430 = vmatprep.subr.mxu0 %v493_v0 }
  0x3c   :  { %431 = vmatpush3.msra.mxu0 %v236_v33 }
  0x3d   :  { %432 = vmatprep.subr.mxu0 %v493_v0 }
  0x3e   :  { %433 = vmatpush3.msra.mxu0 %v235_v34 }
  0x3f   :  { %434 = vmatprep.subr.mxu0 %v493_v0 }
  0x40   :  { %435 = vmatpush3.msra.mxu0 %v234_v35 }
  0xe8   :  { %v135_v29 = vpop.f32.mrf.mxu0 }
  0xe9   :  { %v136_v30 = vadd.f32 %v334_v28, %v135_v29 }
  0xea   :  { %v384_v31 = vpop.f32.mrf.mxu0 }
  0xeb   :  { %v139_v32 = vmax.f32 %v136_v30, 0.0 }
  0xed   :  { %410 = vmatmul.mubr.msk.f32.vlgmr.msra.gmra.mxu1 %vm159_vm2, %v139_v32 }
 0x1ad   :  { %v229_v37 = vpop.f32.mrf.mxu1 }
 0x1ae   :  { %v230_v38 = vadd.f32 %v336_v36, %v229_v37 }
 0x1af   :  { %v411_v39 = vpop.f32.mrf.mxu1 }
 0x1b0   :  { %v233_v40 = vmax.f32 %v230_v38, 0.0 }
 0x1b2   :  { %437 = vmatmul.mubr.msk.f32.vlgmr.msra.gmra.mxu0 %vm159_vm2, %v233_v40 }
 0x272   :  { %v322_v42 = vpop.f32.mrf.mxu0 }
 0x273   :  { %v323_v43 = vadd.f32 %v338_v41, %v322_v42 }
 0x274   :  { %v438_v44 = vpop.f32.mrf.mxu0 }
 0x275   :  { %327 = vst.msk [vmem:[%s669_s7] sm:$0xff] %vm326_vm3, %v323_v43 }
 0x276   :  { %332 = vsyncpa [#allocation3], 1 }
 0x277   :  { %333 = vsyncpa [#allocation5], 1 }

</bundles_post_ra>
